<compile_context>
chip_gen: v7x
topology: tpu7x:2x2x1
jax: 0.10.0
libtpu: 0.0.40
codegen_flags: <defaults>
</compile_context>

<pallas_src>
import jax
import jax.numpy as jnp
from jax.experimental import pallas as pl
from jax.experimental.pallas import tpu as pltpu


# ----------------------------- hardware probes ------------------------------

def _tpu_info():
    try:
        return pltpu.get_tpu_info()
    except Exception:
        return None


def _vmem_capacity_bytes():
    info = _tpu_info()
    if info is not None:
        for name in ("vmem_capacity_bytes", "vmem_bytes", "vmem_capacity"):
            v = getattr(info, name, None)
            if isinstance(v, int) and v > 0:
                return v
    return 128 << 20  # conservative default (v5e/v6e physical VMEM)


def _num_tensorcores():
    info = _tpu_info()
    if info is not None:
        for name in ("num_cores", "cores_per_chip", "num_tensorcores",
                     "tensorcore_count", "core_count"):
            v = getattr(info, name, None)
            if isinstance(v, int) and v > 0:
                return v
    try:
        d = jax.devices()[0]
        for name in ("num_cores", "core_count"):
            v = getattr(d, name, None)
            if isinstance(v, int) and v > 0:
                return v
    except Exception:
        pass
    return 1


# --------------------------------- kernel -----------------------------------

def _sse_kernel(pred_ref, gt_ref, out_ref, acc_ref):
    """Accumulate squared error for one (feature-tile, stack) grid step."""
    k = pl.program_id(1)           # feature-tile axis (reduction)
    s = pl.program_id(2)           # stack axis (reduction; gt DMA reused)
    is_first = jnp.logical_and(k == 0, s == 0)
    is_last = jnp.logical_and(k == pl.num_programs(1) - 1,
                              s == pl.num_programs(2) - 1)

    @pl.when(is_first)
    def _():
        acc_ref[...] = jnp.zeros_like(acc_ref)

    p = pred_ref[...].astype(jnp.float32)   # (N, tk)
    g = gt_ref[...].astype(jnp.float32)     # (N, tk) -- same block across s
    d = p - g
    d2 = d * d

    # Fold the tk/128 lane-groups into the small (N, 128) accumulator with
    # vreg-aligned static slices (pure VPU adds, tiny VMEM RMW footprint).
    tk = d2.shape[-1]
    acc = acc_ref[...]
    for j in range(tk // 128):
        acc = acc + d2[:, j * 128:(j + 1) * 128]
    acc_ref[...] = acc

    @pl.when(is_last)
    def _():
        # Single cross-lane/sublane reduce per core, once in the epilogue.
        total = jnp.sum(acc_ref[...])
        out_ref[...] = jnp.full(out_ref.shape, total, dtype=jnp.float32)


# --------------------------------- wrapper -----------------------------------

def calc_loss_pallas(combined_heatmap_preds, heatmaps_gt):
    """Pallas equivalent of Calc_loss.forward -> scalar mean loss (f32)."""
    N, nstack, C, H, W = combined_heatmap_preds.shape
    assert heatmaps_gt.shape == (N, C, H, W)
    chw = C * H * W
    assert chw % 128 == 0, "C*H*W must be a multiple of 128 (TPU lane width)"
    # TODO(synk): add a masked tail tile so awkward C*H*W (not %128) also works.

    # Split the feature axis across TensorCores only when >1 core exists.
    n_cores = _num_tensorcores()
    n_par = 2 if (n_cores >= 2 and chw % 256 == 0) else 1
    chw_p = chw // n_par

    rows_padded = -(-N // 8) * 8                           # N padded to sublanes
    pred_isz = jnp.dtype(combined_heatmap_preds.dtype).itemsize
    gt_isz = jnp.dtype(heatmaps_gt.dtype).itemsize

    # Per-generation pred-tile budget: v7x (~64 MiB physical VMEM, 3.2 TB/s HBM)
    # wants fewer/fatter steps; v5e/v6e (128 MiB VMEM) use ~4 MiB tiles.
    vmem_cap = _vmem_capacity_bytes()
    tile_budget = (6 << 20) if vmem_cap <= (80 << 20) else (4 << 20)

    # Largest lane tile (multiple of 128 dividing chw_p) within the budget.
    # Cap lanes so the in-kernel static-slice fold stays modest to compile.
    max_lanes = max(128, (tile_budget // (rows_padded * pred_isz)) // 128 * 128)
    max_lanes = min(max_lanes, 32 * 1024)
    tk = 128
    t = 256
    while t <= min(max_lanes, chw_p):
        if chw_p % t == 0:
            tk = t
        t += 128
    n_k = chw_p // tk
    nkt = chw // tk                                        # = n_par * n_k

    # Scoped-VMEM limit: double-buffered pred + gt tiles, the small accumulator
    # and output, plus headroom — bounded by 3/4 of physical VMEM.
    pred_tile_bytes = rows_padded * tk * pred_isz
    gt_tile_bytes = rows_padded * tk * gt_isz
    residency = (2 * (pred_tile_bytes + gt_tile_bytes)
                 + rows_padded * 128 * 4 + n_par * 8 * 128 * 4)
    vmem_limit = max(32 << 20, residency + (4 << 20))
    vmem_limit = min(vmem_limit, (vmem_cap * 3) // 4)
    vmem_limit = max(vmem_limit, residency + (2 << 20))

    # Free reshapes: preds laid out (N, nstack*chw); gt (N, chw). N is the
    # second-to-minor dim, so no nstack->8 sublane-padding waste.
    preds2d = combined_heatmap_preds.reshape(N, nstack * chw)
    gt2d = heatmaps_gt.reshape(N, chw)
    total_elems = float(N * nstack * chw)

    def pred_map(p, k, s, _nkt=nkt, _nk=n_k):
        return (0, s * _nkt + p * _nk + k)

    def gt_map(p, k, s, _nk=n_k):
        # Independent of s (innermost axis) -> Pallas skips the gt re-DMA.
        return (0, p * _nk + k)

    out = pl.pallas_call(
        _sse_kernel,
        out_shape=jax.ShapeDtypeStruct((n_par, 8, 128), jnp.float32),
        grid_spec=pltpu.PrefetchScalarGridSpec(
            num_scalar_prefetch=0,
            grid=(n_par, n_k, nstack),
            in_specs=[
                pl.BlockSpec((N, tk), pred_map),
                pl.BlockSpec((N, tk), gt_map),
            ],
            out_specs=pl.BlockSpec((1, 8, 128), lambda p, k, s: (p, 0, 0)),
            scratch_shapes=[pltpu.VMEM((N, 128), jnp.float32)],
        ),
        compiler_params=pltpu.CompilerParams(
            dimension_semantics=("parallel", "arbitrary", "arbitrary"),
            vmem_limit_bytes=int(vmem_limit),
        ),
    )(preds2d, gt2d)

    # Each core's partial SSE is replicated across its (8,128) output slab.
    return jnp.sum(out[:, 0, 0]) / total_elems


def calc_loss_reference(preds, gt):
    """Pure-JAX reference matching the PyTorch module exactly."""
    d = (preds - gt[:, None]) ** 2                   # (N, nstack, C, H, W)
    per = d.mean(axis=4).mean(axis=3).mean(axis=2)   # (N, nstack)
    return per.mean()


if __name__ == "__main__":
    N, NSTACK, C, H, W = 2, 2, 4, 16, 16
    key = jax.random.PRNGKey(0)
    k1, k2 = jax.random.split(key)
    preds = jax.random.normal(k1, (N, NSTACK, C, H, W), dtype=jnp.float32)
    gt = jax.random.normal(k2, (N, C, H, W), dtype=jnp.float32)

    loss = jax.block_until_ready(calc_loss_pallas(preds, gt))
    ref = jax.block_until_ready(calc_loss_reference(preds, gt))

    assert jnp.allclose(loss, ref, rtol=1e-5, atol=1e-5), (loss, ref)
    print("KERNEL_OK")
</pallas_src>

<mosaic_0001>
module attributes {stable_mosaic.version = 11 : i64} {
  func.func @_sse_kernel(%arg0: i32, %arg1: i32, %arg2: i32, %arg3: memref<2x1024xf32, #tpu.memory_space<vmem>>, %arg4: memref<2x1024xf32, #tpu.memory_space<vmem>>, %arg5: memref<1x8x128xf32, #tpu.memory_space<vmem>>, %arg6: memref<2x128xf32, #tpu.memory_space<vmem>>) attributes {dimension_semantics = [#tpu.dimension_semantics<parallel>, #tpu.dimension_semantics<arbitrary>, #tpu.dimension_semantics<arbitrary>], iteration_bounds = array<i64: 1, 1, 2>, scalar_prefetch = 0 : i64, scratch_operands = 1 : i64, tpu.core_type = #tpu.core_type<tc>, window_params = [{transform_indices = @transform_0, window_bounds = array<i64: 2, 1024>}, {transform_indices = @transform_1, window_bounds = array<i64: 2, 1024>}, {transform_indices = @transform_2, window_bounds = array<i64: 1, 8, 128>}]} {
    %c0_i32 = arith.constant 0 : i32
    %0 = arith.cmpi eq, %arg1, %c0_i32 : i32
    %c0_i32_0 = arith.constant 0 : i32
    %1 = arith.cmpi eq, %arg2, %c0_i32_0 : i32
    %2 = arith.andi %0, %1 : i1
    %c0_i32_1 = arith.constant 0 : i32
    %3 = arith.cmpi eq, %arg1, %c0_i32_1 : i32
    %c1_i32 = arith.constant 1 : i32
    %4 = arith.cmpi eq, %arg2, %c1_i32 : i32
    %5 = arith.andi %3, %4 : i1
    %6 = arith.extui %2 : i1 to i32
    %c0_i32_2 = arith.constant 0 : i32
    %7 = arith.cmpi ne, %6, %c0_i32_2 : i32
    scf.if %7 {
      %cst = arith.constant 0.000000e+00 : f32
      %32 = vector.broadcast %cst : f32 to vector<2x128xf32>
      %c0_11 = arith.constant 0 : index
      %c0_12 = arith.constant 0 : index
      %33 = vector.load %arg6[%c0_11, %c0_12] : memref<2x128xf32, #tpu.memory_space<vmem>>, vector<2x128xf32>
      tpu.vector_store %arg6[%c0_11, %c0_12], %32 {strides = array<i32>} : memref<2x128xf32, #tpu.memory_space<vmem>>, vector<2x128xf32>,
    } else {
    }
    %c0 = arith.constant 0 : index
    %c0_3 = arith.constant 0 : index
    %8 = vector.load %arg3[%c0, %c0_3] : memref<2x1024xf32, #tpu.memory_space<vmem>>, vector<2x1024xf32>
    %c0_4 = arith.constant 0 : index
    %c0_5 = arith.constant 0 : index
    %9 = vector.load %arg4[%c0_4, %c0_5] : memref<2x1024xf32, #tpu.memory_space<vmem>>, vector<2x1024xf32>
    %10 = arith.subf %8, %9 : vector<2x1024xf32>
    %11 = arith.mulf %10, %10 : vector<2x1024xf32>
    %c0_6 = arith.constant 0 : index
    %c0_7 = arith.constant 0 : index
    %12 = vector.load %arg6[%c0_6, %c0_7] : memref<2x128xf32, #tpu.memory_space<vmem>>, vector<2x128xf32>
    %13 = vector.extract_strided_slice %11 {offsets = [0, 0], sizes = [2, 128], strides = [1, 1]} : vector<2x1024xf32> to vector<2x128xf32>
    %14 = arith.addf %12, %13 : vector<2x128xf32>
    %15 = vector.extract_strided_slice %11 {offsets = [0, 128], sizes = [2, 128], strides = [1, 1]} : vector<2x1024xf32> to vector<2x128xf32>
    %16 = arith.addf %14, %15 : vector<2x128xf32>
    %17 = vector.extract_strided_slice %11 {offsets = [0, 256], sizes = [2, 128], strides = [1, 1]} : vector<2x1024xf32> to vector<2x128xf32>
    %18 = arith.addf %16, %17 : vector<2x128xf32>
    %19 = vector.extract_strided_slice %11 {offsets = [0, 384], sizes = [2, 128], strides = [1, 1]} : vector<2x1024xf32> to vector<2x128xf32>
    %20 = arith.addf %18, %19 : vector<2x128xf32>
    %21 = vector.extract_strided_slice %11 {offsets = [0, 512], sizes = [2, 128], strides = [1, 1]} : vector<2x1024xf32> to vector<2x128xf32>
    %22 = arith.addf %20, %21 : vector<2x128xf32>
    %23 = vector.extract_strided_slice %11 {offsets = [0, 640], sizes = [2, 128], strides = [1, 1]} : vector<2x1024xf32> to vector<2x128xf32>
    %24 = arith.addf %22, %23 : vector<2x128xf32>
    %25 = vector.extract_strided_slice %11 {offsets = [0, 768], sizes = [2, 128], strides = [1, 1]} : vector<2x1024xf32> to vector<2x128xf32>
    %26 = arith.addf %24, %25 : vector<2x128xf32>
    %27 = vector.extract_strided_slice %11 {offsets = [0, 896], sizes = [2, 128], strides = [1, 1]} : vector<2x1024xf32> to vector<2x128xf32>
    %28 = arith.addf %26, %27 : vector<2x128xf32>
    %c0_8 = arith.constant 0 : index
    %c0_9 = arith.constant 0 : index
    %29 = vector.load %arg6[%c0_8, %c0_9] : memref<2x128xf32, #tpu.memory_space<vmem>>, vector<2x128xf32>
    tpu.vector_store %arg6[%c0_8, %c0_9], %28 {strides = array<i32>} : memref<2x128xf32, #tpu.memory_space<vmem>>, vector<2x128xf32>,
    %30 = arith.extui %5 : i1 to i32
    %c0_i32_10 = arith.constant 0 : i32
    %31 = arith.cmpi ne, %30, %c0_i32_10 : i32
    scf.if %31 {
      %c0_11 = arith.constant 0 : index
      %c0_12 = arith.constant 0 : index
      %32 = vector.load %arg6[%c0_11, %c0_12] : memref<2x128xf32, #tpu.memory_space<vmem>>, vector<2x128xf32>
      %33 = vector.shape_cast %32 : vector<2x128xf32> to vector<1x2x128xf32>
      %cst = arith.constant dense<0.000000e+00> : vector<1xf32>
      %34 = vector.multi_reduction <add>, %33, %cst [1, 2] : vector<1x2x128xf32> to vector<1xf32>
      %35 = vector.shape_cast %34 : vector<1xf32> to vector<1x1x1xf32>
      %36 = vector.extract %35[0, 0, 0] : f32 from vector<1x1x1xf32>
      %37 = vector.broadcast %36 : f32 to vector<1x8x128xf32>
      %c0_13 = arith.constant 0 : index
      %c0_14 = arith.constant 0 : index
      %c0_15 = arith.constant 0 : index
      %38 = vector.load %arg5[%c0_13, %c0_14, %c0_15] : memref<1x8x128xf32, #tpu.memory_space<vmem>>, vector<1x8x128xf32>
      tpu.vector_store %arg5[%c0_13, %c0_14, %c0_15], %37 {strides = array<i32>} : memref<1x8x128xf32, #tpu.memory_space<vmem>>, vector<1x8x128xf32>,
    } else {
    }
    return
  }
  func.func @transform_0(%arg0: i32, %arg1: i32, %arg2: i32) -> (i32, i32) {
    %c1_i32 = arith.constant 1 : i32
    %0 = arith.muli %arg2, %c1_i32 : i32
    %c1_i32_0 = arith.constant 1 : i32
    %1 = arith.muli %arg0, %c1_i32_0 : i32
    %2 = arith.addi %0, %1 : i32
    %3 = arith.addi %2, %arg1 : i32
    %c0_i32 = arith.constant 0 : i32
    %c0_i32_1 = arith.constant 0 : i32
    return %c0_i32, %3 : i32, i32
  }
  func.func @transform_1(%arg0: i32, %arg1: i32, %arg2: i32) -> (i32, i32) {
    %c1_i32 = arith.constant 1 : i32
    %0 = arith.muli %arg0, %c1_i32 : i32
    %1 = arith.addi %0, %arg1 : i32
    %c0_i32 = arith.constant 0 : i32
    %c0_i32_0 = arith.constant 0 : i32
    return %c0_i32, %1 : i32, i32
  }
  func.func @transform_2(%arg0: i32, %arg1: i32, %arg2: i32) -> (i32, i32, i32) {
    %c0_i32 = arith.constant 0 : i32
    %c0_i32_0 = arith.constant 0 : i32
    %c0_i32_1 = arith.constant 0 : i32
    return %arg0, %c0_i32, %c0_i32_0 : i32, i32, i32
  }
}

</mosaic_0001>

<bundles_post_ra>
// kernel: tpu_custom_call.1
= control target key start
LH: loop header
LB: loop body
LE: loop exit
PB: predicated region body
PF: predicated region fallthrough
CT: control target
= control target key end

     0   :  { %7 = vsyncpa [#allocation4], 0  ;;  %s833_s0 = inlined_call_operand.hbm [shape: f32[2,2048], index: 0, kind: input, shape index: {}]   ;;  %s834_s1 = inlined_call_operand.hbm [shape: f32[2,1024], index: 1, kind: input, shape index: {}]   ;;  %s835_s2 = inlined_call_operand.hbm [shape: f32[1,8,128], index: 2, kind: output, shape index: {}]  }
   0x1   :  { %9 = vsyncpa [#allocation4 + $0x1], 0 }
   0x2   :  { %10 = vsyncpa [#allocation7], 0 }
   0x3   :  { %11 = vsyncpa [#allocation5], 0  ;;  %s641_s9 = smov 0   ;;  %s643_s10 = smov 0  }
   0x4   :  { %s645_s11 = smov 0   ;;  %s647_s12 = smov 0  }
   0x5   :  { %s649_s13 = smov 0   ;;  %s651_s14 = smov 0  }
   0x6 LB: > { %s381_s15 = sadd.s32 4294967295, %s619_s14   ;;  %p60_p0 = scmp.ne.s32.totalorder %s603_s10, %s599_s9  ;;  %s619_s14 = sphi %s651_s14, %s17_s14   ;;  %s615_s13 = sphi %s649_s13, %s855_s13   ;;  %s611_s12 = sphi %s647_s12, %s854_s12   ;;  %s607_s11 = sphi %s645_s11, %s853_s11   ;;  %s603_s10 = sphi %s643_s10, %s852_s10   ;;  %s599_s9 = sphi %s641_s9, %s851_s9  }
   0x7   : > { %p673_p1 = scmp.eq.s32.totalorder %s381_s15, 0  ;;  %p382_p2 = scmp.ge.s32.totalorder %s619_s14, 1 }
   0x8   : > { %p125_p3 = scmp.lt.s32.totalorder %s619_s14, 3  ;;  %s621_s19 = smov [#allocation6]  }
   0x9   : > { %s840_s16 = scalar_select %p673_p1, 1, 0 }
   0xa   : > { %p681_p4 = por %p673_p1, %p60_p0  ;;  %p685_p5 = pnand %p382_p2, %p125_p3 }
   0xb   : > { %s142_s20 = sshll.u32 %s621_s19, 4  ;;  %s29_s22 = sadd.s32 1, %s615_s13  ;;  %s143_s20 = int_to_ptr.vmem [resolvable:$true] %s142_s20 }
   0xc   : > { %s841_s17 = scalar_select %p681_p4, 1, 0 }
   0xd   : > { %s842_s18 = scalar_select %p685_p5, 1, 0 }
   0xe   : > { %p412_p6 = pneg %p685_p5  ;;  %s47_s23 = sadd.s32 1, %s607_s11 }
   0xf   : > { %p699_p8 = scmp.ge.s32.totalorder %s29_s22, 2  ;;  %s477_s27 = scalar_lea.hbm %s834_s1, 256 }
  0x10   : > { %p693_p7 = pnand %p412_p6, %p673_p1  ;;  %p478_p9 = scmp.ne.s32.totalorder %s834_s1, %s477_s27 }
  0x11   : > { %s844_s24 = scalar_select %p699_p8, 1, 0 }
  0x12   : > { %p479_p10 = pneg %p693_p7  ;;  %p484_p13 = scmp.lt.u32.totalorder %s477_s27, %s834_s1 }
  0x14   : > { %p480_p11 = pnand %p479_p10, %p478_p9 }
  0x16   : > { %p481_p12 = pneg %p480_p11 }
  0x18   : > { %p486_p0 = pnand %p484_p13, %p481_p12 }
  0x1a   : > { %489 = shalt.err (!%p486_p0)
}
  0x1b   : > { %s490_s4 = scalar_lea.vmem %s143_s20, 256  ;;  %p498_p1 = scmp.lt.s32.totalorder %s143_s20, %s143_s20 }
  0x1c   : > { %p491_p2 = scmp.ne.s32.totalorder %s143_s20, %s490_s4  ;;  %p499_p4 = scmp.lt.s32.totalorder %s490_s4, %s490_s4 }
  0x1e   : > { %p493_p3 = pnand %p491_p2, %p479_p10  ;;  %p500_p5 = por %p499_p4, %p498_p1 }
  0x20   : > { %p494_p6 = pneg %p493_p3 }
  0x22   : > { %p501_p8 = pnand %p500_p5, %p494_p6 }
  0x24   : > { %504 = shalt.err (!%p501_p8)
}
  0x25   : > { %415 = dma.hbm_to_vmem [thread:$0]  (!%p693_p7), %s834_s1, 256, %s143_s20, [#allocation7]  }
  0x26   : > { %p845_p9 = scmp.ne.s32.totalorder %s844_s24, 0  ;;  %p54_p1 = scmp.ne.s32.totalorder %s607_s11, %s603_s10 }
  0x27   : > { %p55_p4 = scmp.eq.s32.totalorder %s619_s14, 0  ;;  %p421_p5 = scmp.lt.s32.totalorder %s619_s14, 2 }
  0x28   : > { %s857_s22 = smov (%p845_p9, %s29_s22), 0  ;;  %s153_s8 = sand.u32 1, %s607_s11  }
  0x29   : > { %s44_s7 = ssub.s32 %s615_s13, %s857_s22  ;;  %p56_p10 = por %p55_p4, %p54_p1 }
  0x2a   : > { %p45_p8 = scmp.eq.s32.totalorder %s44_s7, 0  ;;  %s397_s9 = sshll.u32 %s615_s13, 8 }
  0x2b   : > { %s385_s21 = sshll.u32 %s153_s8, 4  ;;  %s739_s20 = scalar_lea.hbm %s833_s0, %s397_s9 }
  0x2c   : > { %s734_s19 = scalar_select %p45_p8, %s607_s11, %s47_s23  }
  0x2d   : > { %s157_s24 = scalar_lea.vmem [#allocation3], %s385_s21  ;;  %p741_p7 = pnand %p421_p5, %p56_p10 }
  0x2e   : > { %s167_s27 = sshll.u32 %s157_s24, 4  ;;  %s154_s23 = scalar_lea.sflag [#allocation4], %s153_s8  ;;  %s745_s27 = int_to_ptr.vmem [resolvable:$true] %s167_s27 }
  0x2f   : > { %s505_s29 = scalar_lea.hbm %s739_s20, 256  ;;  %p507_p12 = pneg %p741_p7 }
  0x30   : > { %p506_p11 = scmp.ne.s32.totalorder %s739_s20, %s505_s29  ;;  %s510_s4 = scalar_lea.hbm %s833_s0, 512 }
  0x31   : > { %p511_p2 = scmp.lt.u32.totalorder %s739_s20, %s833_s0  ;;  %p512_p3 = scmp.lt.u32.totalorder %s510_s4, %s505_s29 }
  0x32   : > { %p508_p13 = pnand %p507_p12, %p506_p11  ;;  %p514_p9 = scmp.lt.u32.totalorder %s505_s29, %s739_s20 }
  0x33   : > { %p513_p6 = por %p512_p3, %p511_p2 }
  0x34   : > { %p509_p0 = pneg %p508_p13 }
  0x35   : > { %p515_p1 = por %p514_p9, %p513_p6 }
  0x37   : > { %p516_p4 = pnand %p515_p1, %p509_p0 }
  0x39   : > { %519 = shalt.err (!%p516_p4)
}
  0x3a   : > { %s520_s7 = scalar_lea.vmem %s745_s27, 256  ;;  %s622_s8 = smov [#allocation3]  }
  0x3b   : > { %p521_p5 = scmp.ne.s32.totalorder %s745_s27, %s520_s7  ;;  %s525_s9 = sshll.u32 %s622_s8, 4  ;;  %s526_s9 = int_to_ptr.vmem [resolvable:$false] %s525_s9 }
  0x3c   : > { %s527_s21 = scalar_lea.vmem %s526_s9, 512  ;;  %p528_p11 = scmp.lt.s32.totalorder %s745_s27, %s526_s9 }
  0x3d   : > { %p523_p8 = pnand %p521_p5, %p507_p12  ;;  %p529_p13 = scmp.lt.s32.totalorder %s527_s21, %s520_s7 }
  0x3f   : > { %p524_p10 = pneg %p523_p8  ;;  %p530_p2 = por %p529_p13, %p528_p11 }
  0x41   : > { %p531_p3 = pnand %p530_p2, %p524_p10 }
  0x43   : > { %534 = shalt.err (!%p531_p3)
}
  0x44   : > { %419 = dma.hbm_to_vmem [thread:$0]  (!%p741_p7), %s739_s20, 256, %s745_s27, %s154_s23  }
  0x45   : > { %p847_p0 = scmp.ne.s32.totalorder %s842_s18, 0 }
  0x46   : > { %s178_s25 = sand.u32 (!%p847_p0), 1, %s603_s10   ;;  %p848_p12 = scmp.ne.s32.totalorder (!%p847_p0), %s841_s17, 0 }
  0x47   : > { %176 = sbr.rel (%p847_p0) target bundleno = 356 (0x164), region = 28  ;;  %s389_s26 = sshll.u32 (!%p847_p0), %s178_s25, 4 }
  0x48   : > { %s179_s24 = scalar_lea.sflag (!%p847_p0), [#allocation4], %s178_s25  ;;  %s182_s29 = scalar_lea.vmem (!%p847_p0), [#allocation3], %s389_s26 }
  0x4e   : > { %586 = dma.done.wait (%p848_p12), %s179_s24, 256  }
  0x4f   : > { %588 = vsyncadd (%p848_p12), %s179_s24, 4294967040  ;;  %p849_p6 = scmp.ne.s32.totalorder %s840_s16, 0 }
  0x51   : > { %590 = dma.done.wait (%p849_p6), [#allocation7], 256  }
  0x52   : > { %592 = vsyncadd (%p849_p6), [#allocation7], 4294967040  ;;  %p208_p7 = scmp.eq.s32.totalorder %s611_s12, 0  ;;  %p211_p9 = scmp.eq.s32.totalorder %s611_s12, 1 }
  0x53   : > { %v623_v0 = vmov (%p208_p7), 0.0  }
  0x54   : > { %215 = sbr.rel (!%p208_p7) target bundleno = 91 (0x5b), region = 40  ;;  %216 = vst [vmem:[#allocation2] sm:$0x3] (%p208_p7), %v623_v0 }
  0x5b PF: > { %v217_v1 = vld [vmem:[%s182_s29] sm:$0xff]  ;;  %v218_v2 = vld [vmem:[%s182_s29 + $0x8] sm:$0xff]  ;;  %v231_v4 = vlaneseq  ;;  %v624_v7 = vmov 1983009808   ;;  %vm280_vm0 = vcmask (%p211_p9), 1041408  }
  0x5c   : > { %v219_v3 = vld [vmem:[#allocation6] sm:$0xff]  ;;  %v220_v5 = vld [vmem:[#allocation6 + $0x8] sm:$0xff]  ;;  %v229_v8 = vunpack.c.l.s4 %v624_v7  ;;  %v225_v13 = vld [vmem:[#allocation2] sm:$0x3] }
  0x5d   : > { %v221_v6 = vsub.f32 %v217_v1, %v219_v3  ;;  %v232_v9 = vshrl.u32 %v231_v4, 7  ;;  %v222_v10 = vsub.f32 %v218_v2, %v220_v5 }
  0x5e   : > { %v230_v12 = vunpack.c.0.s8 %v229_v8 }
  0x5f   : > { %v223_v11 = vmul.f32 %v221_v6, %v221_v6  ;;  %v224_v16 = vmul.f32 %v222_v10, %v222_v10 }
  0x60   : > { %v233_v14 = vsub.s32 %v230_v12, %v232_v9 }
  0x61   : > { %v238_v15 = vcombine.high %v223_v11, %v223_v11  ;;  %v226_v17 = vadd.f32 %v225_v13, %v223_v11  ;;  %v263_v24 = vcombine.high %v224_v16, %v224_v16 }
  0x62   : > { %v234_v18 = vrot.slane %v223_v11, %v233_v14  ;;  %v259_v23 = vrot.slane %v224_v16, %v233_v14 }
  0x63   : > { %v245_v19 = vrot.slane %v238_v15, %v233_v14  ;;  %v270_v28 = vrot.slane %v263_v24, %v233_v14 }
  0x64   : > { %v235_v20 = vcombine.high %v234_v18, %v234_v18  ;;  %v260_v27 = vcombine.high %v259_v23, %v259_v23 }
  0x65   : > { %v248_v22 = vcombine.high %v245_v19, %v245_v19  ;;  %v273_v31 = vcombine.high %v270_v28, %v270_v28 }
  0x66   : > { %v237_v21 = vadd.f32 %v235_v20, %v226_v17 }
  0x68   : > { %v247_v25 = vadd.f32 %v245_v19, %v237_v21 }
  0x6a   : > { %v250_v26 = vadd.f32 %v248_v22, %v247_v25 }
  0x6c   : > { %v251_v29 = vadd.f32 %v250_v26, %v224_v16 }
  0x6e   : > { %v262_v30 = vadd.f32 %v260_v27, %v251_v29  ;;  %278 = sbr.rel (!%p211_p9) target bundleno = 331 (0x14b), region = 44 }
  0x70   : > { %v272_v32 = vadd.f32 %v270_v28, %v262_v30 }
  0x72   : > { %v275_v33 = vadd.f32 %v273_v31, %v272_v32 }
  0x74   : > { %276 = vst [vmem:[#allocation2] sm:$0x3] %v275_v33 }
  0x7b   : > { %v279_v34 = vld [vmem:[#allocation2] sm:$0x3] }
  0x7c   : > { %v281_v35 = vsel %vm280_vm0, %v279_v34, 0.0 }
  0x7d   : > { %282 = vadd.xlane.f32.xlu0 %v281_v35 }
 0x10a   : > { %v283_v36 = vpop.xlane.xlu0 %282 }
 0x10b   : > { %v284_v37 = vrot.slane %v283_v36, 4 }
 0x10d   : > { %v285_v38 = vadd.f32 %v284_v37, %v283_v36 }
 0x10f   : > { %v286_v39 = vrot.slane %v285_v38, 2 }
 0x111   : > { %v287_v40 = vadd.f32 %v286_v39, %v285_v38 }
 0x113   : > { %v288_v41 = vrot.slane %v287_v40, 1 }
 0x115   : > { %v289_v42 = vadd.f32 %v288_v41, %v287_v40 }
 0x117   : > { %400 = vpush %v289_v42 }
 0x148   : > { %s401_s16 = spop %400 }
 0x149   : > { %v291_v43 = vstv %s401_s16 }
 0x14a   : > { %292 = vst [vmem:[#allocation8] sm:$0xff] %v291_v43 }
 0x14b PF: > { %p789_p1 = scmp.eq.s32.totalorder %s381_s15, 1  ;;  %s625_s17 = smov [#allocation8]  }
 0x14c   : > { %s302_s18 = sshll.u32 %s625_s17, 4  ;;  %s303_s18 = int_to_ptr.vmem [resolvable:$true] %s302_s18 }
 0x14d   : > { %s535_s20 = scalar_lea.vmem %s303_s18, 128  ;;  %p542_p10 = scmp.lt.s32.totalorder %s303_s18, %s303_s18 }
 0x14e   : > { %p536_p4 = scmp.ne.s32.totalorder %s303_s18, %s535_s20  ;;  %p543_p11 = scmp.lt.s32.totalorder %s535_s20, %s535_s20 }
 0x150   : > { %p537_p5 = pnand %p536_p4, %p789_p1  ;;  %p544_p13 = por %p543_p11, %p542_p10 }
 0x152   : > { %p538_p8 = pneg %p537_p5 }
 0x154   : > { %p545_p2 = pnand %p544_p13, %p538_p8 }
 0x156   : > { %548 = shalt.err (!%p545_p2)
}
 0x157   : > { %s549_s15 = scalar_lea.hbm %s835_s2, 128 }
 0x158   : > { %p550_p3 = scmp.ne.s32.totalorder %s835_s2, %s549_s15  ;;  %p555_p6 = scmp.lt.u32.totalorder %s549_s15, %s835_s2 }
 0x15a   : > { %p551_p0 = pnand %p550_p3, %p789_p1 }
 0x15c   : > { %p552_p12 = pneg %p551_p0 }
 0x15e   : > { %p557_p7 = pnand %p555_p6, %p552_p12 }
 0x160   : > { %560 = shalt.err (!%p557_p7)
}
 0x161   : > { %409 = dma.vmem_to_hbm [thread:$0]  (%p789_p1), %s303_s18, 128, %s835_s2, [#allocation5]  }
 0x162   : > { %594 = dma.done.wait (%p789_p1), [#allocation5], 128  }
 0x163   : > { %596 = vsyncadd (%p789_p1), [#allocation5], 4294967168 }
 0x164 PF: > { %s17_s14 = sadd.s32 1, %s619_s14   ;;  %s851_s9 = smov %s603_s10 }
 0x165   : > { %p14_p9 = scmp.ge.s32.totalorder %s17_s14, 4   ;;  %s852_s10 = smov %s607_s11 }
 0x166   : > { %s853_s11 = smov %s734_s19  ;;  %s854_s12 = smov %s615_s13 }
 0x167   : > { %s855_s13 = smov %s857_s22  ;;  %16 = sbr.rel (!%p14_p9) target bundleno = 6 (0x6), region = 79 }
 0x16e   :  { %315 = vsyncpa [#allocation4], 1 }
 0x16f   :  { %317 = vsyncpa [#allocation4 + $0x1], 1 }
 0x170   :  { %318 = vsyncpa [#allocation7], 1 }
 0x171   :  { %319 = vsyncpa [#allocation5], 1 }
 0x172   :  { %321 = vsyncpa [#allocation5 + $0x1], 1 }

</bundles_post_ra>
